<compile_context>
chip_gen: v7x
topology: tpu7x:2x2x1
jax: 0.10.0
libtpu: 0.0.40
codegen_flags: <defaults>
</compile_context>

<pallas_src>
import functools

import jax
import jax.numpy as jnp
from jax import lax
from jax.experimental import pallas as pl
from jax.experimental.pallas import tpu as pltpu

GAMMA = 2.0  # module default (hard-wired as q*q below)


def _round_up(x, m):
    return (x + m - 1) // m * m


def _focal_kernel(logits_ref, targets_ref, focal_ref, psum_ref, *,
                  total_b, total_c, bt, ct, mask_rows, mask_cols):
    """Elementwise focal loss for one (bt, ct) block + masked per-tile partial sum."""
    x = logits_ref[...].astype(jnp.float32)
    t = targets_ref[...].astype(jnp.float32)

    # Single transcendental exp per element; everything else derived from it.
    e = jnp.exp(-jnp.abs(x))                       # exp(-|x|) in (0, 1]
    # Numerically-stable BCE-with-logits (reduction='none'):
    #   max(x, 0) - x*t + log(1 + exp(-|x|))
    ce = jnp.maximum(x, 0.0) - x * t + jnp.log1p(e)
    # sigmoid(x) from the same exp:  x>=0: 1/(1+e)   x<0: e/(1+e)
    inv = pl.reciprocal(1.0 + e, approx=False)
    probs = jnp.where(x >= 0.0, inv, e * inv)
    # p_t = p*t + (1-p)*(1-t);  focal = ce * (1 - p_t)^2  (gamma=2 -> multiply, no pow)
    p_t = probs * t + (1.0 - probs) * (1.0 - t)
    q = 1.0 - p_t
    focal = ce * q * q
    # TODO(synk): alpha weighting and sample_weight branch (both None in default config).

    focal_ref[...] = focal.astype(focal_ref.dtype)

    # Per-tile partial sum.  `mask_rows`/`mask_cols` are *static* Python flags, so the
    # masking VPU ops only exist when B/C do not divide the tile (cheap either way —
    # the kernel is HBM-bound).  Out-of-bounds rows/cols hold unspecified data, so they
    # must be zeroed before the reduction.
    f = focal
    if mask_rows or mask_cols:
        mask = None
        if mask_rows:
            row = lax.broadcasted_iota(jnp.int32, f.shape, 0) + pl.program_id(0) * bt
            mask = row < total_b
        if mask_cols:
            col = lax.broadcasted_iota(jnp.int32, f.shape, 1) + pl.program_id(1) * ct
            cmask = col < total_c
            mask = cmask if mask is None else jnp.logical_and(mask, cmask)
        f = jnp.where(mask, f, 0.0)
    s = jnp.sum(f)
    # Broadcast into a full (8,128) vreg block -> unmasked store, no cross-step accumulator,
    # so both grid axes stay "parallel" (both v7x TensorCores usable).
    psum_ref[...] = jnp.broadcast_to(s, psum_ref.shape).astype(jnp.float32)


def focal_loss(logits_list, targets, *, tile_bytes=2 * 1024 * 1024, max_rows=1024):
    """Mirrors FocalLoss.forward (gamma=2, alpha=None, sample_weight=None, size_sum=True).

    Targets may be passed in a narrow dtype (bf16 / int8, values 0/1) to cut HBM traffic;
    they are upcast to f32 inside the kernel.  Returns ([loss], [focal_loss]).
    """
    logits = logits_list[0]
    B, C = logits.shape
    out_dtype = logits.dtype

    # ---- tile selection (no host-side padding; partial tiles are masked in-kernel) ----
    # Class dim: keep the full lane-dense C per block unless it is very wide; wide C gets
    # 128-aligned column tiles so the double-buffered VMEM residency stays ~10 MiB.
    max_cols = 16384                              # 64 KiB per f32 row
    c_tile = C if C <= max_cols else max_cols     # full dim, or a multiple of 128
    nc = pl.cdiv(C, c_tile)

    # Batch dim: ~tile_bytes per f32 buffer; balanced tiles so padding is bounded (<32 rows).
    rows_budget = max(32, min(max_rows, (tile_bytes // (c_tile * 4)) // 32 * 32))
    if B <= rows_budget:
        batch_tile = B                            # single row tile, no tail, no masking
    else:
        n_row_tiles = pl.cdiv(B, rows_budget)
        batch_tile = _round_up(pl.cdiv(B, n_row_tiles), 32)
    nr = pl.cdiv(B, batch_tile)

    mask_rows = (B % batch_tile) != 0
    mask_cols = (C % c_tile) != 0

    kernel = functools.partial(
        _focal_kernel,
        total_b=B, total_c=C, bt=batch_tile, ct=c_tile,
        mask_rows=mask_rows, mask_cols=mask_cols)

    focal, psums = pl.pallas_call(
        kernel,
        out_shape=(
            jax.ShapeDtypeStruct((B, C), out_dtype),
            jax.ShapeDtypeStruct((nr, nc, 8, 128), jnp.float32),
        ),
        grid_spec=pltpu.PrefetchScalarGridSpec(
            num_scalar_prefetch=0,
            grid=(nr, nc),
            in_specs=[
                pl.BlockSpec((batch_tile, c_tile), lambda i, j: (i, j)),
                pl.BlockSpec((batch_tile, c_tile), lambda i, j: (i, j)),
            ],
            out_specs=[
                pl.BlockSpec((batch_tile, c_tile), lambda i, j: (i, j)),
                pl.BlockSpec((1, 1, 8, 128), lambda i, j: (i, j, 0, 0)),
            ],
        ),
        compiler_params=pltpu.CompilerParams(
            # Per-tile partial sums -> no cross-step dependency -> both axes parallel.
            # (If profiling on v7x shows a single TC active, switch the row axis to
            #  pltpu.CORE_PARALLEL.)
            dimension_semantics=("parallel", "parallel"),
            # ~10 MiB resident double-buffered; 32 MiB gives headroom and is safe on
            # v5e (128 MiB phys), v6e (128 MiB) and v7x (64 MiB per TC).
            vmem_limit_bytes=32 * 1024 * 1024,
        ),
    )(logits, targets)

    # size_sum=True  ->  loss = focal.sum(1).mean()  ==  total_sum / B
    loss = jnp.sum(psums[:, :, 0, 0]) / jnp.float32(B)
    return ([loss], [focal])


def _reference(logits_list, targets):
    """Pure-JAX reference for correctness check."""
    x = logits_list[0].astype(jnp.float32)
    t = targets.astype(jnp.float32)
    probs = jax.nn.sigmoid(x)
    ce = jnp.maximum(x, 0.0) - x * t + jnp.log1p(jnp.exp(-jnp.abs(x)))
    p_t = probs * t + (1.0 - probs) * (1.0 - t)
    focal = ce * (1.0 - p_t) ** GAMMA
    loss = focal.sum(1).mean()
    return loss, focal


def _run_case(key, B, C, **kw):
    k1, k2 = jax.random.split(key)
    logits = jax.random.normal(k1, (B, C), dtype=jnp.float32) * 2.0
    # Targets are exactly 0/1 -> bf16 is lossless and halves the targets HBM stream.
    targets = (jax.random.uniform(k2, (B, C)) > 0.5).astype(jnp.bfloat16)

    loss_l, focal_l = focal_loss([logits], targets, **kw)
    loss = jax.block_until_ready(loss_l[0])
    focal = jax.block_until_ready(focal_l[0])

    ref_loss, ref_focal = _reference([logits], targets)
    assert focal.shape == (B, C) and focal.dtype == logits.dtype
    assert jnp.allclose(focal, ref_focal, atol=2e-5, rtol=2e-5), f"focal mismatch ({B},{C})"
    assert jnp.allclose(loss, ref_loss, atol=1e-3, rtol=1e-4), f"loss mismatch ({B},{C})"


if __name__ == "__main__":
    key = jax.random.PRNGKey(0)
    k1, k2, k3 = jax.random.split(key, 3)
    _run_case(k1, 16, 128)                   # small exact-tile case (16 samples x 128 attrs)
    _run_case(k2, 300, 96, max_rows=128)     # batch tail -> in-kernel row masking
    _run_case(k3, 8, 20000)                  # wide C -> column tiling + column masking
    print("KERNEL_OK")
</pallas_src>

<mosaic_0001>
module attributes {stable_mosaic.version = 11 : i64} {
  func.func @_focal_kernel(%arg0: i32, %arg1: i32, %arg2: memref<16x128xf32, #tpu.memory_space<vmem>>, %arg3: memref<16x128xbf16, #tpu.memory_space<vmem>>, %arg4: memref<16x128xf32, #tpu.memory_space<vmem>>, %arg5: memref<1x1x8x128xf32, #tpu.memory_space<vmem>>) attributes {dimension_semantics = [#tpu.dimension_semantics<parallel>, #tpu.dimension_semantics<parallel>], iteration_bounds = array<i64: 1, 1>, scalar_prefetch = 0 : i64, scratch_operands = 0 : i64, tpu.core_type = #tpu.core_type<tc>, window_params = [{transform_indices = @transform_0, window_bounds = array<i64: 16, 128>}, {transform_indices = @transform_1, window_bounds = array<i64: 16, 128>}, {transform_indices = @transform_2, window_bounds = array<i64: 16, 128>}, {transform_indices = @transform_3, window_bounds = array<i64: 1, 1, 8, 128>}]} {
    %c0 = arith.constant 0 : index
    %c0_0 = arith.constant 0 : index
    %0 = vector.load %arg2[%c0, %c0_0] : memref<16x128xf32, #tpu.memory_space<vmem>>, vector<16x128xf32>
    %c0_1 = arith.constant 0 : index
    %c0_2 = arith.constant 0 : index
    %1 = vector.load %arg3[%c0_1, %c0_2] : memref<16x128xbf16, #tpu.memory_space<vmem>>, vector<16x128xbf16>
    %2 = arith.extf %1 : vector<16x128xbf16> to vector<16x128xf32>
    %3 = math.absf %0 : vector<16x128xf32>
    %cst = arith.constant 0.000000e+00 : f32
    %4 = vector.broadcast %cst : f32 to vector<16x128xf32>
    %5 = arith.subf %4, %3 : vector<16x128xf32>
    %6 = math.exp %5 : vector<16x128xf32>
    %cst_3 = arith.constant 0.000000e+00 : f32
    %7 = vector.broadcast %cst_3 : f32 to vector<16x128xf32>
    %8 = arith.maximumf %0, %7 : vector<16x128xf32>
    %9 = arith.mulf %0, %2 : vector<16x128xf32>
    %10 = arith.subf %8, %9 : vector<16x128xf32>
    %11 = math.log1p %6 : vector<16x128xf32>
    %12 = arith.addf %10, %11 : vector<16x128xf32>
    %cst_4 = arith.constant 1.000000e+00 : f32
    %13 = vector.broadcast %cst_4 : f32 to vector<16x128xf32>
    %14 = arith.addf %13, %6 : vector<16x128xf32>
    %15 = tpu.reciprocal %14 : vector<16x128xf32> -> vector<16x128xf32>
    %cst_5 = arith.constant 0.000000e+00 : f32
    %16 = vector.broadcast %cst_5 : f32 to vector<16x128xf32>
    %17 = arith.cmpf oge, %0, %16 : vector<16x128xf32>
    %18 = arith.mulf %6, %15 : vector<16x128xf32>
    %19 = arith.select %17, %15, %18 : vector<16x128xi1>, vector<16x128xf32>
    %20 = arith.mulf %19, %2 : vector<16x128xf32>
    %cst_6 = arith.constant 1.000000e+00 : f32
    %21 = vector.broadcast %cst_6 : f32 to vector<16x128xf32>
    %22 = arith.subf %21, %19 : vector<16x128xf32>
    %cst_7 = arith.constant 1.000000e+00 : f32
    %23 = vector.broadcast %cst_7 : f32 to vector<16x128xf32>
    %24 = arith.subf %23, %2 : vector<16x128xf32>
    %25 = arith.mulf %22, %24 : vector<16x128xf32>
    %26 = arith.addf %20, %25 : vector<16x128xf32>
    %cst_8 = arith.constant 1.000000e+00 : f32
    %27 = vector.broadcast %cst_8 : f32 to vector<16x128xf32>
    %28 = arith.subf %27, %26 : vector<16x128xf32>
    %29 = arith.mulf %12, %28 : vector<16x128xf32>
    %30 = arith.mulf %29, %28 : vector<16x128xf32>
    %c0_9 = arith.constant 0 : index
    %c0_10 = arith.constant 0 : index
    %31 = vector.load %arg4[%c0_9, %c0_10] : memref<16x128xf32, #tpu.memory_space<vmem>>, vector<16x128xf32>
    tpu.vector_store %arg4[%c0_9, %c0_10], %30 {strides = array<i32>} : memref<16x128xf32, #tpu.memory_space<vmem>>, vector<16x128xf32>,
    %32 = vector.shape_cast %30 : vector<16x128xf32> to vector<1x16x128xf32>
    %cst_11 = arith.constant dense<0.000000e+00> : vector<1xf32>
    %33 = vector.multi_reduction <add>, %32, %cst_11 [1, 2] : vector<1x16x128xf32> to vector<1xf32>
    %34 = vector.shape_cast %33 : vector<1xf32> to vector<1x1x1xf32>
    %35 = vector.extract %34[0, 0, 0] : f32 from vector<1x1x1xf32>
    %36 = vector.broadcast %35 : f32 to vector<1x1x8x128xf32>
    %c0_12 = arith.constant 0 : index
    %c0_13 = arith.constant 0 : index
    %c0_14 = arith.constant 0 : index
    %c0_15 = arith.constant 0 : index
    %37 = vector.load %arg5[%c0_12, %c0_13, %c0_14, %c0_15] : memref<1x1x8x128xf32, #tpu.memory_space<vmem>>, vector<1x1x8x128xf32>
    tpu.vector_store %arg5[%c0_12, %c0_13, %c0_14, %c0_15], %36 {strides = array<i32>} : memref<1x1x8x128xf32, #tpu.memory_space<vmem>>, vector<1x1x8x128xf32>,
    return
  }
  func.func @transform_0(%arg0: i32, %arg1: i32) -> (i32, i32) {
    %c0_i32 = arith.constant 0 : i32
    return %arg0, %arg1 : i32, i32
  }
  func.func @transform_1(%arg0: i32, %arg1: i32) -> (i32, i32) {
    %c0_i32 = arith.constant 0 : i32
    return %arg0, %arg1 : i32, i32
  }
  func.func @transform_2(%arg0: i32, %arg1: i32) -> (i32, i32) {
    %c0_i32 = arith.constant 0 : i32
    return %arg0, %arg1 : i32, i32
  }
  func.func @transform_3(%arg0: i32, %arg1: i32) -> (i32, i32, i32, i32) {
    %c0_i32 = arith.constant 0 : i32
    %c0_i32_0 = arith.constant 0 : i32
    %c0_i32_1 = arith.constant 0 : i32
    return %arg0, %arg1, %c0_i32, %c0_i32_0 : i32, i32, i32, i32
  }
}

</mosaic_0001>

<bundles_post_ra>
// kernel: tpu_custom_call.1
= control target key start
LH: loop header
LB: loop body
LE: loop exit
PB: predicated region body
PF: predicated region fallthrough
CT: control target
= control target key end

     0   :  { %9 = vsyncpa [#allocation3], 0  ;;  %s371_s0 = inlined_call_operand.hbm [shape: f32[16,128], index: 0, kind: input, shape index: {}]   ;;  %s372_s1 = inlined_call_operand.hbm [shape: bf16[16,128], index: 1, kind: input, shape index: {}]   ;;  %s373_s2 = inlined_call_operand.hbm [shape: f32[16,128], index: 2, kind: output, shape index: {0}]   ;;  %s374_s3 = inlined_call_operand.hbm [shape: f32[1,1,8,128], index: 3, kind: output, shape index: {1}]  }
   0x1   :  { %10 = vsyncpa [#allocation6], 0 }
   0x2   :  { %11 = vsyncpa [#allocation4], 0 }
   0x3   :  { %12 = vsyncpa [#allocation9], 0  ;;  %s277_s12 = smov [#allocation2]   ;;  %s181_s16 = scalar_lea.hbm %s371_s0, 256 }
   0x4   :  { %s18_s13 = sshll.u32 %s277_s12, 4  ;;  %p182_p0 = scmp.ne.s32.totalorder %s371_s0, %s181_s16  ;;  %s19_s13 = int_to_ptr.vmem [resolvable:$true] %s18_s13 }
   0x5   :  { %p185_p1 = scmp.lt.u32.totalorder %s181_s16, %s371_s0 }
   0x7   :  { %p187_p2 = pnand %p185_p1, %p182_p0 }
   0x9   :  { %190 = shalt.err (!%p187_p2)
}
   0xa   :  { %s191_s21 = scalar_lea.vmem %s19_s13, 256  ;;  %p196_p4 = scmp.lt.s32.totalorder %s19_s13, %s19_s13 }
   0xb   :  { %p192_p3 = scmp.ne.s32.totalorder %s19_s13, %s191_s21  ;;  %p197_p5 = scmp.lt.s32.totalorder %s191_s21, %s191_s21 }
   0xd   :  { %p198_p6 = por %p197_p5, %p196_p4 }
   0xf   :  { %p199_p7 = pnand %p198_p6, %p192_p3 }
  0x11   :  { %202 = shalt.err (!%p199_p7)
}
  0x12   :  { %s278_s22 = smov 128   ;;  %s279_s23 = smov 8  }
  0x13   :  { %24 = dma.hbm_to_vmem [thread:$0]  %s371_s0, 256, %s19_s13, [#allocation3], %s278_s22, %s278_s22, %s279_s23  }
  0x14   :  { %s280_s26 = smov [#allocation5]   ;;  %s203_s30 = scalar_lea.hbm %s372_s1, 128 }
  0x15   :  { %s30_s27 = sshll.u32 %s280_s26, 4  ;;  %p204_p8 = scmp.ne.s32.totalorder %s372_s1, %s203_s30  ;;  %s31_s27 = int_to_ptr.vmem [resolvable:$true] %s30_s27 }
  0x16   :  { %p207_p9 = scmp.lt.u32.totalorder %s203_s30, %s372_s1 }
  0x18   :  { %p209_p10 = pnand %p207_p9, %p204_p8 }
  0x1a   :  { %212 = shalt.err (!%p209_p10)
}
  0x1b   :  { %s213_s8 = scalar_lea.vmem %s31_s27, 128  ;;  %p218_p12 = scmp.lt.s32.totalorder %s31_s27, %s31_s27 }
  0x1c   :  { %p214_p11 = scmp.ne.s32.totalorder %s31_s27, %s213_s8  ;;  %p219_p13 = scmp.lt.s32.totalorder %s213_s8, %s213_s8 }
  0x1e   :  { %p220_p0 = por %p219_p13, %p218_p12 }
  0x20   :  { %p221_p1 = pnand %p220_p0, %p214_p11 }
  0x22   :  { %224 = shalt.err (!%p221_p1)
}
  0x23   :  { %s281_s0 = smov 64   ;;  %s282_s9 = smov 4  }
  0x24   :  { %36 = dma.hbm_to_vmem [thread:$0]  %s372_s1, 128, %s31_s27, [#allocation6], %s281_s0, %s281_s0, %s282_s9  }
  0x25   :  { %269 = dma.done.wait [#allocation3], 256  }
  0x26   :  { %270 = vsyncadd [#allocation3], 4294967040 }
  0x27   :  { %271 = dma.done.wait [#allocation6], 128  }
  0x28   :  { %272 = vsyncadd [#allocation6], 4294967168  ;;  %v43_v0 = vld [vmem:[#allocation2] sm:$0xff]  ;;  %v44_v1 = vld [vmem:[#allocation2 + $0x8] sm:$0xff]  ;;  %s283_s1 = smov [#allocation7]  }
  0x29   :  { %v49_v2 = vand.u32 2147483647, %v43_v0  ;;  %v50_v3 = vand.u32 2147483647, %v44_v1  ;;  %v156_v13 = vld [vmem:[#allocation5] sm:$0xff]   ;;  %v57_v22 = vmax.f32 %v43_v0, 0.0 }
  0x2a   :  { %v157_v15 = vunpack.c.l.bf16 %v156_v13  ;;  %v158_v18 = vunpack.c.h.bf16 %v156_v13  ;;  %v58_v23 = vmax.f32 %v44_v1, 0.0  ;;  %vm87_vm0 = vcmp.ge.f32.partialorder %v43_v0, 0.0  ;;  %s128_s12 = sshll.u32 %s283_s1, 4  ;;  %s129_s12 = int_to_ptr.vmem [resolvable:$true] %s128_s12 }
  0x2b   :  { %v51_v4 = vsub.f32 0.0, %v49_v2  ;;  %v52_v5 = vsub.f32 0.0, %v50_v3  ;;  %vm88_vm1 = vcmp.ge.f32.partialorder %v44_v1, 0.0  ;;  %s225_s13 = scalar_lea.vmem %s129_s12, 256  ;;  %p230_p3 = scmp.lt.s32.totalorder %s129_s12, %s129_s12 }
  0x2c   :  { %v59_v26 = vmul.f32 %v157_v15, %v43_v0  ;;  %v60_v27 = vmul.f32 %v158_v18, %v44_v1  ;;  %v97_v32 = vsub.f32 1.0, %v157_v15  ;;  %v98_v39 = vsub.f32 1.0, %v158_v18  ;;  %p226_p2 = scmp.ne.s32.totalorder %s129_s12, %s225_s13  ;;  %p231_p4 = scmp.lt.s32.totalorder %s225_s13, %s225_s13 }
  0x2d   :  { %v53_v6 = vmul.f32 1.442695, %v51_v4  ;;  %v55_v7 = vmul.f32 1.442695, %v52_v5 }
  0x2e   :  { %v61_v40 = vsub.f32 %v57_v22, %v59_v26  ;;  %v62_v44 = vsub.f32 %v58_v23, %v60_v27  ;;  %p232_p5 = por %p231_p4, %p230_p3 }
  0x2f   :  { %169 = vpow2.f32 %v53_v6 }
  0x30   :  { %171 = vpow2.f32 %v55_v7  ;;  %p233_p6 = pnand %p232_p5, %p226_p2 }
  0x39   :  { %v170_v8 = vpop.eup %169 }
  0x3a   :  { %v172_v9 = vpop.eup %171  ;;  %v63_v10 = vadd.f32 1.0, %v170_v8  ;;  %v66_v12 = vmul.f32 -0.5, %v170_v8  ;;  %v69_v19 = vand.u32 2147483647, %v170_v8 }
  0x3b   :  { %v72_v11 = vadd.f32 1.0, %v172_v9  ;;  %v75_v14 = vmul.f32 -0.5, %v172_v9  ;;  %v78_v24 = vand.u32 2147483647, %v172_v9 }
  0x3c   :  { %173 = vlog2.f32 %v63_v10  ;;  %v67_v16 = vadd.f32 1.0, %v66_v12  ;;  %vm332_vm2 = vcmp.lt.f32.partialorder %v69_v19, 0.0004427343 }
  0x3d   :  { %175 = vlog2.f32 %v72_v11  ;;  %v76_v20 = vadd.f32 1.0, %v75_v14  ;;  %vm336_vm3 = vcmp.lt.f32.partialorder %v78_v24, 0.0004427343 }
  0x3e   :  { %177 = vrcp.f32 %v63_v10  ;;  %v68_v30 = vmul.f32 %v170_v8, %v67_v16 }
  0x3f   :  { %179 = vrcp.f32 %v72_v11  ;;  %v77_v35 = vmul.f32 %v172_v9, %v76_v20 }
  0x46   :  { %v174_v17 = vpop.eup %173 }
  0x47   :  { %v176_v21 = vpop.eup %175  ;;  %v65_v29 = vmul.f32 0.6931472, %v174_v17 }
  0x48   :  { %v178_v25 = vpop.eup %177  ;;  %v74_v34 = vmul.f32 0.6931472, %v176_v21 }
  0x49   :  { %v180_v28 = vpop.eup %179  ;;  %v89_v31 = vmul.f32 %v178_v25, %v170_v8  ;;  %v71_v45 = vsel %vm332_vm2, %v68_v30, %v65_v29 }
  0x4a   :  { %v90_v36 = vmul.f32 %v180_v28, %v172_v9  ;;  %v80_v48 = vsel %vm336_vm3, %v77_v35, %v74_v34  ;;  %v81_v51 = vadd.f32 %v71_v45, %v61_v40 }
  0x4b   :  { %v91_v38 = vsel %vm87_vm0, %v178_v25, %v89_v31  ;;  %v82_v53 = vadd.f32 %v80_v48, %v62_v44 }
  0x4c   :  { %v92_v41 = vsel %vm88_vm1, %v180_v28, %v90_v36  ;;  %v93_v42 = vmul.f32 %v157_v15, %v91_v38  ;;  %v95_v43 = vsub.f32 1.0, %v91_v38 }
  0x4d   :  { %v94_v46 = vmul.f32 %v158_v18, %v92_v41  ;;  %v96_v47 = vsub.f32 1.0, %v92_v41 }
  0x4e   :  { %v99_v49 = vmul.f32 %v97_v32, %v95_v43 }
  0x4f   :  { %v100_v50 = vmul.f32 %v98_v39, %v96_v47 }
  0x50   :  { %v101_v52 = vadd.f32 %v99_v49, %v93_v42 }
  0x51   :  { %v102_v54 = vadd.f32 %v100_v50, %v94_v46 }
  0x52   :  { %v103_v55 = vsub.f32 1.0, %v101_v52 }
  0x53   :  { %v104_v56 = vsub.f32 1.0, %v102_v54 }
  0x54   :  { %v105_v57 = vmul.f32 %v103_v55, %v81_v51 }
  0x55   :  { %v106_v58 = vmul.f32 %v104_v56, %v82_v53 }
  0x56   :  { %v107_v59 = vmul.f32 %v105_v57, %v103_v55 }
  0x57   :  { %v108_v60 = vmul.f32 %v106_v58, %v104_v56 }
  0x58   :  { %109 = vst [vmem:[#allocation7] sm:$0xff] %v107_v59 }
  0x59   :  { %v111_v61 = vadd.f32 %v108_v60, %v107_v59  ;;  %110 = vst [vmem:[#allocation7 + $0x8] sm:$0xff] %v108_v60 }
  0x5b   :  { %112 = vadd.xlane.f32.xlu0 %v111_v61 }
  0x5c   :  { %236 = shalt.err (!%p233_p6)
}
  0x5d   :  { %s237_s16 = scalar_lea.hbm %s373_s2, 256 }
  0x5e   :  { %p238_p7 = scmp.ne.s32.totalorder %s373_s2, %s237_s16  ;;  %p241_p8 = scmp.lt.u32.totalorder %s237_s16, %s373_s2 }
  0x60   :  { %p243_p9 = pnand %p241_p8, %p238_p7 }
  0x62   :  { %246 = shalt.err (!%p243_p9)
}
  0x63   :  { %134 = dma.vmem_to_hbm [thread:$0]  %s129_s12, 256, %s373_s2, [#allocation4], %s278_s22, %s278_s22, %s279_s23  }
  0x64   :  { %s284_s25 = smov [#allocation8]  }
  0x65   :  { %s141_s26 = sshll.u32 %s284_s25, 4  ;;  %s142_s26 = int_to_ptr.vmem [resolvable:$true] %s141_s26 }
  0x66   :  { %s247_s28 = scalar_lea.vmem %s142_s26, 128  ;;  %p252_p11 = scmp.lt.s32.totalorder %s142_s26, %s142_s26 }
  0x67   :  { %p248_p10 = scmp.ne.s32.totalorder %s142_s26, %s247_s28  ;;  %p253_p12 = scmp.lt.s32.totalorder %s247_s28, %s247_s28 }
  0x69   :  { %p254_p13 = por %p253_p12, %p252_p11 }
  0x6b   :  { %p255_p0 = pnand %p254_p13, %p248_p10 }
  0xe8   :  { %v113_v62 = vpop.xlane.xlu0 %112 }
  0xe9   :  { %v114_v63 = vrot.slane %v113_v62, 4 }
  0xeb   :  { %v115_v0 = vadd.f32 %v114_v63, %v113_v62 }
  0xed   :  { %v116_v1 = vrot.slane %v115_v0, 2 }
  0xef   :  { %v117_v2 = vadd.f32 %v116_v1, %v115_v0 }
  0xf1   :  { %v118_v3 = vrot.slane %v117_v2, 1 }
  0xf3   :  { %v119_v4 = vadd.f32 %v118_v3, %v117_v2 }
  0xf5   :  { %159 = vpush %v119_v4 }
 0x126   :  { %s160_s27 = spop %159 }
 0x127   :  { %v121_v5 = vstv %s160_s27 }
 0x128   :  { %122 = vst [vmem:[#allocation8] sm:$0xff] %v121_v5 }
 0x129   :  { %258 = shalt.err (!%p255_p0)
}
 0x12a   :  { %s259_s23 = scalar_lea.hbm %s374_s3, 128 }
 0x12b   :  { %p260_p1 = scmp.ne.s32.totalorder %s374_s3, %s259_s23  ;;  %p263_p2 = scmp.lt.u32.totalorder %s259_s23, %s374_s3 }
 0x12d   :  { %p265_p3 = pnand %p263_p2, %p260_p1 }
 0x12f   :  { %268 = shalt.err (!%p265_p3)
}
 0x130   :  { %144 = dma.vmem_to_hbm [thread:$0]  %s142_s26, 128, %s374_s3, [#allocation9]  }
 0x131   :  { %273 = dma.done.wait [#allocation4], 256  }
 0x132   :  { %274 = vsyncadd [#allocation4], 4294967040 }
 0x133   :  { %275 = dma.done.wait [#allocation9], 128  }
 0x134   :  { %276 = vsyncadd [#allocation9], 4294967168 }
 0x135   :  { %151 = vsyncpa [#allocation3], 1 }
 0x136   :  { %152 = vsyncpa [#allocation6], 1 }
 0x137   :  { %153 = vsyncpa [#allocation4], 1 }
 0x138   :  { %154 = vsyncpa [#allocation9], 1 }

</bundles_post_ra>
